<compile_context>
chip_gen: v6e
topology: v6e:2x2x1
jax: 0.10.0
libtpu: 0.0.40
codegen_flags: <defaults>
</compile_context>

<pallas_src>
import functools

import numpy as np
import jax
import jax.numpy as jnp
from jax.experimental import pallas as pl
from jax.experimental.pallas import tpu as pltpu


# ---------------- constants: pooling / upsampling / rank-1 mean matrices ----------------

def _pool_matrix(size_in, patch, stride):
    n_out = (size_in - patch) // stride + 1
    m = np.zeros((n_out, size_in), np.float32)
    for i in range(n_out):
        m[i, i * stride:i * stride + patch] = 1.0 / patch
    return m


def _nearest_matrix(n_out, n_in):
    # PyTorch F.interpolate(mode='nearest'): src = floor(dst * n_in / n_out)
    m = np.zeros((n_out, n_in), np.float32)
    for i in range(n_out):
        m[i, (i * n_in) // n_out] = 1.0
    return m


@functools.lru_cache(maxsize=None)
def _build_constants(H, W, patch_sizes):
    """Per-scale row/col matrices + rank-1 mean weights.  Cached per geometry."""
    rows, cols = [], []
    Hb = Wb = None
    for idx, P in enumerate(patch_sizes):
        s = P // 2
        ph = _pool_matrix(H, P, s)
        pw = _pool_matrix(W, P, s)
        if idx == 0:
            Hb, Wb = ph.shape[0], pw.shape[0]
            rh, rw = ph, pw
        else:
            rh = _nearest_matrix(Hb, ph.shape[0]) @ ph      # [Hb, H]
            rw = _nearest_matrix(Wb, pw.shape[0]) @ pw      # [Wb, W]
        rows.append(rh)
        cols.append(rw)

    r_all = np.stack(rows, axis=0)                          # [L, Hb, H]
    ct_all = np.concatenate([c.T for c in cols], axis=1)    # [W, L*Wb]
    # rank-1 mean weights: mean_{c,l} = sum_{h,w} x[c,h,w] * u_l[h] * v_l[w] / (Hb*Wb)
    mvec = np.stack(
        [np.outer(r.sum(0), c.sum(0)).reshape(H * W) / (Hb * Wb)
         for r, c in zip(rows, cols)], axis=1)              # [H*W, L]
    return ct_all, r_all, mvec, Hb, Wb


# ---------------- Pallas kernel ----------------

def pyramid_pool_kernel(xr_ref, xf_ref, ct_ref, mvec_ref, r_ref,
                        w1_ref, b1_ref, w2_ref, b2_ref, out_ref,
                        *, L, C, H, Hb, Wb):
    x2 = xr_ref[0]                                           # [C*H, W]   bf16
    xf = xf_ref[0]                                           # [C, H*W]   bf16

    # ---- rank-1 spatial means for all (channel, scale) pairs: ONE matmul ----
    means = jnp.dot(xf, mvec_ref[...],
                    preferred_element_type=jnp.float32)      # [C, L] f32

    # ---- SE attention over scales, computed before the scale loop ----
    h1 = jnp.maximum(
        jnp.dot(means, w1_ref[...], preferred_element_type=jnp.float32)
        + b1_ref[...], 0.0)                                  # [C, hs]
    logits = jnp.dot(h1, w2_ref[...],
                     preferred_element_type=jnp.float32) + b2_ref[...]
    logits = logits - jnp.max(logits, axis=-1, keepdims=True)
    e = jnp.exp(logits)
    att = e * pl.reciprocal(jnp.sum(e, axis=-1, keepdims=True),
                            approx=True)                     # [C, L]

    # ---- stage 1: column pooling for ALL scales fused into one MXU call ----
    t = jnp.dot(x2, ct_ref[...],
                preferred_element_type=jnp.float32)          # [C*H, L*Wb]
    tb = t.astype(jnp.bfloat16)

    # ---- stage 2: per-channel row pooling + attention-weighted accumulate ----
    for c in range(C):                                       # static unroll
        acc = jnp.zeros((Hb, Wb), jnp.float32)
        for l in range(L):
            y = jnp.dot(r_ref[l],
                        tb[c * H:(c + 1) * H, l * Wb:(l + 1) * Wb],
                        preferred_element_type=jnp.float32)  # [Hb, Wb]
            acc = acc + y * att[c:c + 1, l:l + 1]            # VPU broadcast
        out_ref[0, c] = acc.astype(out_ref.dtype)


# ---------------- wrapper ----------------

@functools.partial(jax.jit, static_argnums=(1,))
def pyramid_pooling(x, patch_sizes, w1, b1, w2, b2):
    patch_sizes = tuple(sorted(patch_sizes))
    N, C, H, W = x.shape
    L = len(patch_sizes)
    hs = w1.shape[1]

    ct_np, r_np, mvec_np, Hb, Wb = _build_constants(H, W, patch_sizes)

    # 1/P is exact in bf16 for power-of-two patch sizes; keep f32 otherwise.
    pool_dtype = (jnp.bfloat16
                  if all((p & (p - 1)) == 0 for p in patch_sizes) else jnp.float32)
    ct_all = jnp.asarray(ct_np, pool_dtype)                  # [W, L*Wb]
    r_all = jnp.asarray(r_np, pool_dtype)                    # [L, Hb, H]
    mvec = jnp.asarray(mvec_np, jnp.bfloat16)                # [H*W, L]

    xb = x.astype(jnp.bfloat16)
    xr = xb.reshape(N, C * H, W)                             # pooling view
    xf = xb.reshape(N, C, H * W)                             # rank-1 mean view
    w1f = w1.astype(jnp.float32)
    w2f = w2.astype(jnp.float32)
    b1_2d = b1.reshape(1, hs).astype(jnp.float32)
    b2_2d = b2.reshape(1, L).astype(jnp.float32)

    kernel = functools.partial(pyramid_pool_kernel, L=L, C=C, H=H, Hb=Hb, Wb=Wb)
    out = pl.pallas_call(
        kernel,
        out_shape=jax.ShapeDtypeStruct((N, C, Hb, Wb), jnp.float32),
        grid_spec=pltpu.PrefetchScalarGridSpec(
            num_scalar_prefetch=0,
            grid=(N,),
            in_specs=[
                pl.BlockSpec((1, C * H, W), lambda n: (n, 0, 0)),
                pl.BlockSpec((1, C, H * W), lambda n: (n, 0, 0)),
                pl.BlockSpec((W, L * Wb), lambda n: (0, 0)),
                pl.BlockSpec((H * W, L), lambda n: (0, 0)),
                pl.BlockSpec((L, Hb, H), lambda n: (0, 0, 0)),
                pl.BlockSpec((L, hs), lambda n: (0, 0)),
                pl.BlockSpec((1, hs), lambda n: (0, 0)),
                pl.BlockSpec((hs, L), lambda n: (0, 0)),
                pl.BlockSpec((1, L), lambda n: (0, 0)),
            ],
            out_specs=pl.BlockSpec((1, C, Hb, Wb), lambda n: (n, 0, 0, 0)),
        ),
        compiler_params=pltpu.CompilerParams(
            dimension_semantics=("parallel",),          # megacore over batch
            vmem_limit_bytes=32 * 1024 * 1024,          # explicit; working set << limit
        ),
    )(xr, xf, ct_all, mvec, r_all, w1f, b1_2d, w2f, b2_2d)
    return out


# ---------------- numpy reference (mirrors the PyTorch forward) ----------------

def ref_forward_np(x, patch_sizes, w1, b1, w2, b2):
    patch_sizes = sorted(patch_sizes)
    N, C, H, W = x.shape
    maps = []
    for P in patch_sizes:
        s = P // 2
        Ho, Wo = (H - P) // s + 1, (W - P) // s + 1
        out = np.zeros((N, C, Ho, Wo), np.float32)
        for i in range(Ho):
            for j in range(Wo):
                out[:, :, i, j] = x[:, :, i * s:i * s + P, j * s:j * s + P].mean(axis=(2, 3))
        maps.append(out)
    Hb, Wb = maps[0].shape[-2:]
    ups = [maps[0]]
    for m in maps[1:]:
        hin, win = m.shape[-2:]
        ri = (np.arange(Hb) * hin) // Hb
        ci = (np.arange(Wb) * win) // Wb
        ups.append(m[:, :, ri][:, :, :, ci])
    Y = np.stack(ups, axis=-1)                      # [N, C, Hb, Wb, L]
    mean = Y.mean(axis=(2, 3))                      # [N, C, L]
    h = np.maximum(mean @ w1 + b1, 0.0)
    logits = h @ w2 + b2
    e = np.exp(logits - logits.max(-1, keepdims=True))
    att = e / e.sum(-1, keepdims=True)
    return (Y * att[:, :, None, None, :]).sum(-1)   # [N, C, Hb, Wb]


if __name__ == "__main__":
    N, C, H, W = 2, 4, 16, 16
    patch_sizes = (4, 8)     # even, power-of-two -> bf16 pool weights are exact
    L = len(patch_sizes)
    hs = 128                 # SEBlock default hidden size

    key = jax.random.PRNGKey(0)
    kx, k1, k2, k3 = jax.random.split(key, 4)
    x = jax.random.normal(kx, (N, C, H, W), dtype=jnp.float32)
    # synthetic SEBlock params: Linear(L, hs) -> ReLU -> Linear(hs, L) -> Softmax
    w1 = jax.random.normal(k1, (L, hs), dtype=jnp.float32) * 0.3
    b1 = jax.random.normal(k2, (hs,), dtype=jnp.float32) * 0.1
    w2 = jax.random.normal(k3, (hs, L), dtype=jnp.float32) * 0.3
    b2 = jnp.full((L,), 1.0 / L, dtype=jnp.float32)   # nn.init.constant_(bias, 1/L)

    out = pyramid_pooling(x, patch_sizes, w1, b1, w2, b2)
    out = jax.block_until_ready(out)

    ref = ref_forward_np(np.asarray(x), list(patch_sizes), np.asarray(w1),
                         np.asarray(b1), np.asarray(w2), np.asarray(b2))
    assert out.shape == ref.shape, (out.shape, ref.shape)
    err = float(np.max(np.abs(np.asarray(out, np.float32) - ref)))
    # bf16 matmul operands -> slightly looser tolerance than pure f32
    assert np.allclose(np.asarray(out, np.float32), ref, atol=2e-2, rtol=2e-2), err
    print("KERNEL_OK")
</pallas_src>

<mosaic_0001>
module attributes {stable_mosaic.version = 11 : i64} {
  func.func @pyramid_pool_kernel(%arg0: i32, %arg1: memref<1x64x16xbf16, #tpu.memory_space<vmem>>, %arg2: memref<1x4x256xbf16, #tpu.memory_space<vmem>>, %arg3: memref<16x14xbf16, #tpu.memory_space<vmem>>, %arg4: memref<256x2xbf16, #tpu.memory_space<vmem>>, %arg5: memref<2x7x16xbf16, #tpu.memory_space<vmem>>, %arg6: memref<2x128xf32, #tpu.memory_space<vmem>>, %arg7: memref<1x128xf32, #tpu.memory_space<vmem>>, %arg8: memref<128x2xf32, #tpu.memory_space<vmem>>, %arg9: memref<1x2xf32, #tpu.memory_space<vmem>>, %arg10: memref<1x4x7x7xf32, #tpu.memory_space<vmem>>) attributes {dimension_semantics = [#tpu.dimension_semantics<parallel>], iteration_bounds = array<i64: 2>, scalar_prefetch = 0 : i64, scratch_operands = 0 : i64, tpu.core_type = #tpu.core_type<tc>, window_params = [{transform_indices = @transform_0, window_bounds = array<i64: 1, 64, 16>}, {transform_indices = @transform_1, window_bounds = array<i64: 1, 4, 256>}, {pipeline_mode = #tpu.pipeline_mode<synchronous>, transform_indices = @transform_2, window_bounds = array<i64: 16, 14>}, {pipeline_mode = #tpu.pipeline_mode<synchronous>, transform_indices = @transform_3, window_bounds = array<i64: 256, 2>}, {pipeline_mode = #tpu.pipeline_mode<synchronous>, transform_indices = @transform_4, window_bounds = array<i64: 2, 7, 16>}, {pipeline_mode = #tpu.pipeline_mode<synchronous>, transform_indices = @transform_5, window_bounds = array<i64: 2, 128>}, {pipeline_mode = #tpu.pipeline_mode<synchronous>, transform_indices = @transform_6, window_bounds = array<i64: 1, 128>}, {pipeline_mode = #tpu.pipeline_mode<synchronous>, transform_indices = @transform_7, window_bounds = array<i64: 128, 2>}, {pipeline_mode = #tpu.pipeline_mode<synchronous>, transform_indices = @transform_8, window_bounds = array<i64: 1, 2>}, {transform_indices = @transform_9, window_bounds = array<i64: 1, 4, 7, 7>}]} {
    %c0 = arith.constant 0 : index
    %c0_0 = arith.constant 0 : index
    %c0_1 = arith.constant 0 : index
    %0 = vector.load %arg1[%c0, %c0_0, %c0_1] : memref<1x64x16xbf16, #tpu.memory_space<vmem>>, vector<1x64x16xbf16>
    %1 = vector.shape_cast %0 : vector<1x64x16xbf16> to vector<64x16xbf16>
    %c0_2 = arith.constant 0 : index
    %c0_3 = arith.constant 0 : index
    %c0_4 = arith.constant 0 : index
    %2 = vector.load %arg2[%c0_2, %c0_3, %c0_4] : memref<1x4x256xbf16, #tpu.memory_space<vmem>>, vector<1x4x256xbf16>
    %3 = vector.shape_cast %2 : vector<1x4x256xbf16> to vector<4x256xbf16>
    %c0_5 = arith.constant 0 : index
    %c0_6 = arith.constant 0 : index
    %4 = vector.load %arg4[%c0_5, %c0_6] : memref<256x2xbf16, #tpu.memory_space<vmem>>, vector<256x2xbf16>
    %cst = arith.constant dense<0.000000e+00> : vector<4x2xf32>
    %5 = tpu.matmul %3, %4, %cst {dimension_numbers = #tpu.dot_dimension_numbers<[1], [0], [0], [1], [0, 0, 1, 1], [], []>} : vector<4x256xbf16>, vector<256x2xbf16>, vector<4x2xf32> -> vector<4x2xf32>
    %c0_7 = arith.constant 0 : index
    %c0_8 = arith.constant 0 : index
    %6 = vector.load %arg6[%c0_7, %c0_8] : memref<2x128xf32, #tpu.memory_space<vmem>>, vector<2x128xf32>
    %cst_9 = arith.constant dense<0.000000e+00> : vector<4x128xf32>
    %7 = tpu.matmul %5, %6, %cst_9 {dimension_numbers = #tpu.dot_dimension_numbers<[1], [0], [0], [1], [0, 0, 1, 1], [], []>} : vector<4x2xf32>, vector<2x128xf32>, vector<4x128xf32> -> vector<4x128xf32>
    %c0_10 = arith.constant 0 : index
    %c0_11 = arith.constant 0 : index
    %8 = vector.load %arg7[%c0_10, %c0_11] : memref<1x128xf32, #tpu.memory_space<vmem>>, vector<1x128xf32>
    %9 = vector.broadcast %8 : vector<1x128xf32> to vector<4x128xf32>
    %10 = arith.addf %7, %9 : vector<4x128xf32>
    %cst_12 = arith.constant 0.000000e+00 : f32
    %11 = vector.broadcast %cst_12 : f32 to vector<4x128xf32>
    %12 = arith.maximumf %10, %11 : vector<4x128xf32>
    %c0_13 = arith.constant 0 : index
    %c0_14 = arith.constant 0 : index
    %13 = vector.load %arg8[%c0_13, %c0_14] : memref<128x2xf32, #tpu.memory_space<vmem>>, vector<128x2xf32>
    %cst_15 = arith.constant dense<0.000000e+00> : vector<4x2xf32>
    %14 = tpu.matmul %12, %13, %cst_15 {dimension_numbers = #tpu.dot_dimension_numbers<[1], [0], [0], [1], [0, 0, 1, 1], [], []>} : vector<4x128xf32>, vector<128x2xf32>, vector<4x2xf32> -> vector<4x2xf32>
    %c0_16 = arith.constant 0 : index
    %c0_17 = arith.constant 0 : index
    %15 = vector.load %arg9[%c0_16, %c0_17] : memref<1x2xf32, #tpu.memory_space<vmem>>, vector<1x2xf32>
    %16 = vector.broadcast %15 : vector<1x2xf32> to vector<4x2xf32>
    %17 = arith.addf %14, %16 : vector<4x2xf32>
    %cst_18 = arith.constant dense<0xFF800000> : vector<4xf32>
    %18 = vector.multi_reduction <maximumf>, %17, %cst_18 [1] : vector<4x2xf32> to vector<4xf32>
    %19 = vector.shape_cast %18 : vector<4xf32> to vector<4x1xf32>
    %20 = vector.broadcast %19 : vector<4x1xf32> to vector<4x2xf32>
    %21 = arith.subf %17, %20 : vector<4x2xf32>
    %22 = math.exp %21 : vector<4x2xf32>
    %cst_19 = arith.constant dense<0.000000e+00> : vector<4xf32>
    %23 = vector.multi_reduction <add>, %22, %cst_19 [1] : vector<4x2xf32> to vector<4xf32>
    %24 = vector.shape_cast %23 : vector<4xf32> to vector<4x1xf32>
    %25 = tpu.reciprocal %24 {approx = true} : vector<4x1xf32> -> vector<4x1xf32>
    %26 = vector.broadcast %25 : vector<4x1xf32> to vector<4x2xf32>
    %27 = arith.mulf %22, %26 : vector<4x2xf32>
    %c0_20 = arith.constant 0 : index
    %c0_21 = arith.constant 0 : index
    %28 = vector.load %arg3[%c0_20, %c0_21] : memref<16x14xbf16, #tpu.memory_space<vmem>>, vector<16x14xbf16>
    %cst_22 = arith.constant dense<0.000000e+00> : vector<64x14xf32>
    %29 = tpu.matmul %1, %28, %cst_22 {dimension_numbers = #tpu.dot_dimension_numbers<[1], [0], [0], [1], [0, 0, 1, 1], [], []>} : vector<64x16xbf16>, vector<16x14xbf16>, vector<64x14xf32> -> vector<64x14xf32>
    %30 = arith.truncf %29 : vector<64x14xf32> to vector<64x14xbf16>
    %cst_23 = arith.constant 0.000000e+00 : f32
    %31 = vector.broadcast %cst_23 : f32 to vector<7x7xf32>
    %c0_24 = arith.constant 0 : index
    %c0_25 = arith.constant 0 : index
    %c0_26 = arith.constant 0 : index
    %32 = vector.load %arg5[%c0_24, %c0_25, %c0_26] : memref<2x7x16xbf16, #tpu.memory_space<vmem>>, vector<1x7x16xbf16>
    %33 = vector.shape_cast %32 : vector<1x7x16xbf16> to vector<7x16xbf16>
    %34 = vector.extract_strided_slice %30 {offsets = [0, 0], sizes = [16, 7], strides = [1, 1]} : vector<64x14xbf16> to vector<16x7xbf16>
    %cst_27 = arith.constant dense<0.000000e+00> : vector<7x7xf32>
    %35 = tpu.matmul %33, %34, %cst_27 {dimension_numbers = #tpu.dot_dimension_numbers<[1], [0], [0], [1], [0, 0, 1, 1], [], []>} : vector<7x16xbf16>, vector<16x7xbf16>, vector<7x7xf32> -> vector<7x7xf32>
    %36 = vector.extract_strided_slice %27 {offsets = [0, 0], sizes = [1, 1], strides = [1, 1]} : vector<4x2xf32> to vector<1x1xf32>
    %37 = vector.broadcast %36 : vector<1x1xf32> to vector<7x7xf32>
    %38 = arith.mulf %35, %37 : vector<7x7xf32>
    %39 = arith.addf %31, %38 : vector<7x7xf32>
    %c1 = arith.constant 1 : index
    %c0_28 = arith.constant 0 : index
    %c0_29 = arith.constant 0 : index
    %40 = vector.load %arg5[%c1, %c0_28, %c0_29] : memref<2x7x16xbf16, #tpu.memory_space<vmem>>, vector<1x7x16xbf16>
    %41 = vector.shape_cast %40 : vector<1x7x16xbf16> to vector<7x16xbf16>
    %42 = vector.extract_strided_slice %30 {offsets = [0, 7], sizes = [16, 7], strides = [1, 1]} : vector<64x14xbf16> to vector<16x7xbf16>
    %cst_30 = arith.constant dense<0.000000e+00> : vector<7x7xf32>
    %43 = tpu.matmul %41, %42, %cst_30 {dimension_numbers = #tpu.dot_dimension_numbers<[1], [0], [0], [1], [0, 0, 1, 1], [], []>} : vector<7x16xbf16>, vector<16x7xbf16>, vector<7x7xf32> -> vector<7x7xf32>
    %44 = vector.extract_strided_slice %27 {offsets = [0, 1], sizes = [1, 1], strides = [1, 1]} : vector<4x2xf32> to vector<1x1xf32>
    %45 = vector.broadcast %44 : vector<1x1xf32> to vector<7x7xf32>
    %46 = arith.mulf %43, %45 : vector<7x7xf32>
    %47 = arith.addf %39, %46 : vector<7x7xf32>
    %c0_31 = arith.constant 0 : index
    %c0_32 = arith.constant 0 : index
    %c0_33 = arith.constant 0 : index
    %c0_34 = arith.constant 0 : index
    %48 = vector.load %arg10[%c0_31, %c0_32, %c0_33, %c0_34] : memref<1x4x7x7xf32, #tpu.memory_space<vmem>>, vector<1x1x7x7xf32>
    %49 = vector.shape_cast %48 : vector<1x1x7x7xf32> to vector<7x7xf32>
    %50 = vector.shape_cast %47 : vector<7x7xf32> to vector<1x1x7x7xf32>
    tpu.vector_store %arg10[%c0_31, %c0_32, %c0_33, %c0_34], %50 {strides = array<i32>} : memref<1x4x7x7xf32, #tpu.memory_space<vmem>>, vector<1x1x7x7xf32>,
    %cst_35 = arith.constant 0.000000e+00 : f32
    %51 = vector.broadcast %cst_35 : f32 to vector<7x7xf32>
    %c0_36 = arith.constant 0 : index
    %c0_37 = arith.constant 0 : index
    %c0_38 = arith.constant 0 : index
    %52 = vector.load %arg5[%c0_36, %c0_37, %c0_38] : memref<2x7x16xbf16, #tpu.memory_space<vmem>>, vector<1x7x16xbf16>
    %53 = vector.shape_cast %52 : vector<1x7x16xbf16> to vector<7x16xbf16>
    %54 = vector.extract_strided_slice %30 {offsets = [16, 0], sizes = [16, 7], strides = [1, 1]} : vector<64x14xbf16> to vector<16x7xbf16>
    %cst_39 = arith.constant dense<0.000000e+00> : vector<7x7xf32>
    %55 = tpu.matmul %53, %54, %cst_39 {dimension_numbers = #tpu.dot_dimension_numbers<[1], [0], [0], [1], [0, 0, 1, 1], [], []>} : vector<7x16xbf16>, vector<16x7xbf16>, vector<7x7xf32> -> vector<7x7xf32>
    %56 = vector.extract_strided_slice %27 {offsets = [1, 0], sizes = [1, 1], strides = [1, 1]} : vector<4x2xf32> to vector<1x1xf32>
    %57 = vector.broadcast %56 : vector<1x1xf32> to vector<7x7xf32>
    %58 = arith.mulf %55, %57 : vector<7x7xf32>
    %59 = arith.addf %51, %58 : vector<7x7xf32>
    %c1_40 = arith.constant 1 : index
    %c0_41 = arith.constant 0 : index
    %c0_42 = arith.constant 0 : index
    %60 = vector.load %arg5[%c1_40, %c0_41, %c0_42] : memref<2x7x16xbf16, #tpu.memory_space<vmem>>, vector<1x7x16xbf16>
    %61 = vector.shape_cast %60 : vector<1x7x16xbf16> to vector<7x16xbf16>
    %62 = vector.extract_strided_slice %30 {offsets = [16, 7], sizes = [16, 7], strides = [1, 1]} : vector<64x14xbf16> to vector<16x7xbf16>
    %cst_43 = arith.constant dense<0.000000e+00> : vector<7x7xf32>
    %63 = tpu.matmul %61, %62, %cst_43 {dimension_numbers = #tpu.dot_dimension_numbers<[1], [0], [0], [1], [0, 0, 1, 1], [], []>} : vector<7x16xbf16>, vector<16x7xbf16>, vector<7x7xf32> -> vector<7x7xf32>
    %64 = vector.extract_strided_slice %27 {offsets = [1, 1], sizes = [1, 1], strides = [1, 1]} : vector<4x2xf32> to vector<1x1xf32>
    %65 = vector.broadcast %64 : vector<1x1xf32> to vector<7x7xf32>
    %66 = arith.mulf %63, %65 : vector<7x7xf32>
    %67 = arith.addf %59, %66 : vector<7x7xf32>
    %c0_44 = arith.constant 0 : index
    %c1_45 = arith.constant 1 : index
    %c0_46 = arith.constant 0 : index
    %c0_47 = arith.constant 0 : index
    %68 = vector.load %arg10[%c0_44, %c1_45, %c0_46, %c0_47] : memref<1x4x7x7xf32, #tpu.memory_space<vmem>>, vector<1x1x7x7xf32>
    %69 = vector.shape_cast %68 : vector<1x1x7x7xf32> to vector<7x7xf32>
    %70 = vector.shape_cast %67 : vector<7x7xf32> to vector<1x1x7x7xf32>
    tpu.vector_store %arg10[%c0_44, %c1_45, %c0_46, %c0_47], %70 {strides = array<i32>} : memref<1x4x7x7xf32, #tpu.memory_space<vmem>>, vector<1x1x7x7xf32>,
    %cst_48 = arith.constant 0.000000e+00 : f32
    %71 = vector.broadcast %cst_48 : f32 to vector<7x7xf32>
    %c0_49 = arith.constant 0 : index
    %c0_50 = arith.constant 0 : index
    %c0_51 = arith.constant 0 : index
    %72 = vector.load %arg5[%c0_49, %c0_50, %c0_51] : memref<2x7x16xbf16, #tpu.memory_space<vmem>>, vector<1x7x16xbf16>
    %73 = vector.shape_cast %72 : vector<1x7x16xbf16> to vector<7x16xbf16>
    %74 = vector.extract_strided_slice %30 {offsets = [32, 0], sizes = [16, 7], strides = [1, 1]} : vector<64x14xbf16> to vector<16x7xbf16>
    %cst_52 = arith.constant dense<0.000000e+00> : vector<7x7xf32>
    %75 = tpu.matmul %73, %74, %cst_52 {dimension_numbers = #tpu.dot_dimension_numbers<[1], [0], [0], [1], [0, 0, 1, 1], [], []>} : vector<7x16xbf16>, vector<16x7xbf16>, vector<7x7xf32> -> vector<7x7xf32>
    %76 = vector.extract_strided_slice %27 {offsets = [2, 0], sizes = [1, 1], strides = [1, 1]} : vector<4x2xf32> to vector<1x1xf32>
    %77 = vector.broadcast %76 : vector<1x1xf32> to vector<7x7xf32>
    %78 = arith.mulf %75, %77 : vector<7x7xf32>
    %79 = arith.addf %71, %78 : vector<7x7xf32>
    %c1_53 = arith.constant 1 : index
    %c0_54 = arith.constant 0 : index
    %c0_55 = arith.constant 0 : index
    %80 = vector.load %arg5[%c1_53, %c0_54, %c0_55] : memref<2x7x16xbf16, #tpu.memory_space<vmem>>, vector<1x7x16xbf16>
    %81 = vector.shape_cast %80 : vector<1x7x16xbf16> to vector<7x16xbf16>
    %82 = vector.extract_strided_slice %30 {offsets = [32, 7], sizes = [16, 7], strides = [1, 1]} : vector<64x14xbf16> to vector<16x7xbf16>
    %cst_56 = arith.constant dense<0.000000e+00> : vector<7x7xf32>
    %83 = tpu.matmul %81, %82, %cst_56 {dimension_numbers = #tpu.dot_dimension_numbers<[1], [0], [0], [1], [0, 0, 1, 1], [], []>} : vector<7x16xbf16>, vector<16x7xbf16>, vector<7x7xf32> -> vector<7x7xf32>
    %84 = vector.extract_strided_slice %27 {offsets = [2, 1], sizes = [1, 1], strides = [1, 1]} : vector<4x2xf32> to vector<1x1xf32>
    %85 = vector.broadcast %84 : vector<1x1xf32> to vector<7x7xf32>
    %86 = arith.mulf %83, %85 : vector<7x7xf32>
    %87 = arith.addf %79, %86 : vector<7x7xf32>
    %c0_57 = arith.constant 0 : index
    %c2 = arith.constant 2 : index
    %c0_58 = arith.constant 0 : index
    %c0_59 = arith.constant 0 : index
    %88 = vector.load %arg10[%c0_57, %c2, %c0_58, %c0_59] : memref<1x4x7x7xf32, #tpu.memory_space<vmem>>, vector<1x1x7x7xf32>
    %89 = vector.shape_cast %88 : vector<1x1x7x7xf32> to vector<7x7xf32>
    %90 = vector.shape_cast %87 : vector<7x7xf32> to vector<1x1x7x7xf32>
    tpu.vector_store %arg10[%c0_57, %c2, %c0_58, %c0_59], %90 {strides = array<i32>} : memref<1x4x7x7xf32, #tpu.memory_space<vmem>>, vector<1x1x7x7xf32>,
    %cst_60 = arith.constant 0.000000e+00 : f32
    %91 = vector.broadcast %cst_60 : f32 to vector<7x7xf32>
    %c0_61 = arith.constant 0 : index
    %c0_62 = arith.constant 0 : index
    %c0_63 = arith.constant 0 : index
    %92 = vector.load %arg5[%c0_61, %c0_62, %c0_63] : memref<2x7x16xbf16, #tpu.memory_space<vmem>>, vector<1x7x16xbf16>
    %93 = vector.shape_cast %92 : vector<1x7x16xbf16> to vector<7x16xbf16>
    %94 = vector.extract_strided_slice %30 {offsets = [48, 0], sizes = [16, 7], strides = [1, 1]} : vector<64x14xbf16> to vector<16x7xbf16>
    %cst_64 = arith.constant dense<0.000000e+00> : vector<7x7xf32>
    %95 = tpu.matmul %93, %94, %cst_64 {dimension_numbers = #tpu.dot_dimension_numbers<[1], [0], [0], [1], [0, 0, 1, 1], [], []>} : vector<7x16xbf16>, vector<16x7xbf16>, vector<7x7xf32> -> vector<7x7xf32>
    %96 = vector.extract_strided_slice %27 {offsets = [3, 0], sizes = [1, 1], strides = [1, 1]} : vector<4x2xf32> to vector<1x1xf32>
    %97 = vector.broadcast %96 : vector<1x1xf32> to vector<7x7xf32>
    %98 = arith.mulf %95, %97 : vector<7x7xf32>
    %99 = arith.addf %91, %98 : vector<7x7xf32>
    %c1_65 = arith.constant 1 : index
    %c0_66 = arith.constant 0 : index
    %c0_67 = arith.constant 0 : index
    %100 = vector.load %arg5[%c1_65, %c0_66, %c0_67] : memref<2x7x16xbf16, #tpu.memory_space<vmem>>, vector<1x7x16xbf16>
    %101 = vector.shape_cast %100 : vector<1x7x16xbf16> to vector<7x16xbf16>
    %102 = vector.extract_strided_slice %30 {offsets = [48, 7], sizes = [16, 7], strides = [1, 1]} : vector<64x14xbf16> to vector<16x7xbf16>
    %cst_68 = arith.constant dense<0.000000e+00> : vector<7x7xf32>
    %103 = tpu.matmul %101, %102, %cst_68 {dimension_numbers = #tpu.dot_dimension_numbers<[1], [0], [0], [1], [0, 0, 1, 1], [], []>} : vector<7x16xbf16>, vector<16x7xbf16>, vector<7x7xf32> -> vector<7x7xf32>
    %104 = vector.extract_strided_slice %27 {offsets = [3, 1], sizes = [1, 1], strides = [1, 1]} : vector<4x2xf32> to vector<1x1xf32>
    %105 = vector.broadcast %104 : vector<1x1xf32> to vector<7x7xf32>
    %106 = arith.mulf %103, %105 : vector<7x7xf32>
    %107 = arith.addf %99, %106 : vector<7x7xf32>
    %c0_69 = arith.constant 0 : index
    %c3 = arith.constant 3 : index
    %c0_70 = arith.constant 0 : index
    %c0_71 = arith.constant 0 : index
    %108 = vector.load %arg10[%c0_69, %c3, %c0_70, %c0_71] : memref<1x4x7x7xf32, #tpu.memory_space<vmem>>, vector<1x1x7x7xf32>
    %109 = vector.shape_cast %108 : vector<1x1x7x7xf32> to vector<7x7xf32>
    %110 = vector.shape_cast %107 : vector<7x7xf32> to vector<1x1x7x7xf32>
    tpu.vector_store %arg10[%c0_69, %c3, %c0_70, %c0_71], %110 {strides = array<i32>} : memref<1x4x7x7xf32, #tpu.memory_space<vmem>>, vector<1x1x7x7xf32>,
    return
  }
  func.func @transform_0(%arg0: i32) -> (i32, i32, i32) {
    %c0_i32 = arith.constant 0 : i32
    %c0_i32_0 = arith.constant 0 : i32
    %c0_i32_1 = arith.constant 0 : i32
    return %arg0, %c0_i32, %c0_i32_0 : i32, i32, i32
  }
  func.func @transform_1(%arg0: i32) -> (i32, i32, i32) {
    %c0_i32 = arith.constant 0 : i32
    %c0_i32_0 = arith.constant 0 : i32
    %c0_i32_1 = arith.constant 0 : i32
    return %arg0, %c0_i32, %c0_i32_0 : i32, i32, i32
  }
  func.func @transform_2(%arg0: i32) -> (i32, i32) {
    %c0_i32 = arith.constant 0 : i32
    %c0_i32_0 = arith.constant 0 : i32
    %c0_i32_1 = arith.constant 0 : i32
    return %c0_i32, %c0_i32_0 : i32, i32
  }
  func.func @transform_3(%arg0: i32) -> (i32, i32) {
    %c0_i32 = arith.constant 0 : i32
    %c0_i32_0 = arith.constant 0 : i32
    %c0_i32_1 = arith.constant 0 : i32
    return %c0_i32, %c0_i32_0 : i32, i32
  }
  func.func @transform_4(%arg0: i32) -> (i32, i32, i32) {
    %c0_i32 = arith.constant 0 : i32
    %c0_i32_0 = arith.constant 0 : i32
    %c0_i32_1 = arith.constant 0 : i32
    %c0_i32_2 = arith.constant 0 : i32
    return %c0_i32, %c0_i32_0, %c0_i32_1 : i32, i32, i32
  }
  func.func @transform_5(%arg0: i32) -> (i32, i32) {
    %c0_i32 = arith.constant 0 : i32
    %c0_i32_0 = arith.constant 0 : i32
    %c0_i32_1 = arith.constant 0 : i32
    return %c0_i32, %c0_i32_0 : i32, i32
  }
  func.func @transform_6(%arg0: i32) -> (i32, i32) {
    %c0_i32 = arith.constant 0 : i32
    %c0_i32_0 = arith.constant 0 : i32
    %c0_i32_1 = arith.constant 0 : i32
    return %c0_i32, %c0_i32_0 : i32, i32
  }
  func.func @transform_7(%arg0: i32) -> (i32, i32) {
    %c0_i32 = arith.constant 0 : i32
    %c0_i32_0 = arith.constant 0 : i32
    %c0_i32_1 = arith.constant 0 : i32
    return %c0_i32, %c0_i32_0 : i32, i32
  }
  func.func @transform_8(%arg0: i32) -> (i32, i32) {
    %c0_i32 = arith.constant 0 : i32
    %c0_i32_0 = arith.constant 0 : i32
    %c0_i32_1 = arith.constant 0 : i32
    return %c0_i32, %c0_i32_0 : i32, i32
  }
  func.func @transform_9(%arg0: i32) -> (i32, i32, i32, i32) {
    %c0_i32 = arith.constant 0 : i32
    %c0_i32_0 = arith.constant 0 : i32
    %c0_i32_1 = arith.constant 0 : i32
    %c0_i32_2 = arith.constant 0 : i32
    return %arg0, %c0_i32, %c0_i32_0, %c0_i32_1 : i32, i32, i32, i32
  }
}

</mosaic_0001>

<bundles_post_ra>
// kernel: pyramid_pooling.1
= control target key start
LH: loop header
LB: loop body
LE: loop exit
PB: predicated region body
PF: predicated region fallthrough
CT: control target
= control target key end

     0   :  { %s1676_s30 = smov 0   ;;  %s1908_s0 = inlined_call_operand.vmem [shape: bf16[2,64,16], index: 0, kind: input, shape index: {}]   ;;  %s1909_s1 = inlined_call_operand.vmem [shape: bf16[2,4,256], index: 1, kind: input, shape index: {}]   ;;  %s1910_s2 = inlined_call_operand.vmem [shape: bf16[16,14], index: 2, kind: input, shape index: {}]   ;;  %s1911_s3 = inlined_call_operand.vmem [shape: bf16[256,2], index: 3, kind: input, shape index: {}]   ;;  %s1912_s4 = inlined_call_operand.vmem [shape: bf16[2,7,16], index: 4, kind: input, shape index: {}]   ;;  %s1913_s5 = inlined_call_operand.vmem [shape: f32[2,128], index: 5, kind: input, shape index: {}]   ;;  %s1914_s6 = inlined_call_operand.vmem [shape: f32[1,128], index: 6, kind: input, shape index: {}]   ;;  %s1915_s7 = inlined_call_operand.vmem [shape: f32[128,2], index: 7, kind: input, shape index: {}]   ;;  %s1916_s8 = inlined_call_operand.vmem [shape: f32[1,2], index: 8, kind: input, shape index: {}]   ;;  %s1917_s9 = inlined_call_operand.vmem [shape: f32[2,4,7,7], index: 9, kind: output, shape index: {}]  }
   0x1 LB: > { %s1340_s10 = sadd.s32 4294967295, %s1620_s30   ;;  %p1344_p0 = scmp.ge.s32.totalorder %s1620_s30, 1  ;;  %s1620_s30 = sphi %s1676_s30, %s19_s30  }
   0x2   : > { %p297_p1 = scmp.lt.s32.totalorder %s1620_s30, 3 }
   0x4   : > { %p298_p2 = pnand %p1344_p0, %p297_p1 }
   0x5   : > { %p338_p3 = scmp.lt.s32.totalorder (!%p298_p2), %s1340_s10, 1  ;;  %s1625_s19 = smov (!%p298_p2), 127  }
   0x6   : > { %301 = sbr.rel (%p298_p2) target bundleno = 1128 (0x468), region = 56 }
   0xb   : > { %v1589_v0 = vld [vmem:[%s1911_s3 + $0x78] sm:$0xff]   ;;  %v1591_v2 = vld [vmem:[%s1911_s3 + $0x70] sm:$0xff]   ;;  %v1593_v4 = vld [vmem:[%s1911_s3 + $0x68] sm:$0xff]   ;;  %s1919_s10 = smov (!%p338_p3, %s1340_s10), 1  ;;  %v1622_v18 = vmov 0.0   ;;  %vm554_vm0 = vcmask 1041408  }
   0xc   : > { %v1590_v1 = vld [vmem:[%s1911_s3 + $0x38] sm:$0xff]   ;;  %1401 = vmatprep.subr.bf16.mxu0 %v1589_v0  ;;  %v1592_v3 = vld [vmem:[%s1911_s3 + $0x30] sm:$0xff]   ;;  %v1594_v5 = vld [vmem:[%s1911_s3 + $0x28] sm:$0xff]   ;;  %s1399_s25 = sshll.u32 %s1919_s10, 2  ;;  %s1398_s11 = sshll.u32 %s1919_s10, 5  ;;  %1463 = vmatprep.subr.mxu1 %v1622_v18  ;;  %vm1623_vm1 = vmmov 0  }
   0xd   : > { %1402 = vmatpush3.bf16.msra.mxu0 %v1590_v1  ;;  %v1595_v6 = vld [vmem:[%s1911_s3 + $0x60] sm:$0xff]   ;;  %v1597_v8 = vld [vmem:[%s1911_s3 + $0x58] sm:$0xff]   ;;  %s347_s14 = scalar_lea.vmem %s1909_s1, %s1399_s25  ;;  %v1599_v10 = vld [vmem:[%s1911_s3 + $0x50] sm:$0xff]   ;;  %s1729_s21 = scalar_lea.vmem %s1908_s0, %s1398_s11  ;;  %1465 = vmatprep.mubr.msk.f32.mxu1 %vm1623_vm1, %v1622_v18  ;;  %vm550_vm2 = vcmask 15360   ;;  %vm762_vm3 = vcmask 130048   ;;  %vm722_vm4 = vcmask 11264  }
   0xe   : > { %1403 = vmatprep.subr.bf16.mxu0 %v1591_v2  ;;  %v1596_v7 = vld [vmem:[%s1911_s3 + $0x20] sm:$0xff]   ;;  %v1598_v9 = vld [vmem:[%s1911_s3 + $0x18] sm:$0xff]   ;;  %v1600_v12 = vld [vmem:[%s1911_s3 + $0x10] sm:$0xff]   ;;  %s352_s25 = scalar_lea.vmem %s1917_s9, %s1398_s11  ;;  %vm950_vm5 = vcmask 55296  }
   0xf   : > { %v1351_v11 = vld.sshfl [vmem:[%s347_s14] sm:$0x33 pattern:$0x76325410]  ;;  %v1601_v14 = vld [vmem:[%s1911_s3 + $0x48] sm:$0xff]   ;;  %v644_v23 = vld [vmem:[%s1915_s7 + $0x78] sm:$0xff] }
  0x10   : > { %v403_v13 = vcombine.high %v1351_v11, %v1351_v11  ;;  %v1602_v15 = vld [vmem:[%s1911_s3 + $0x8] sm:$0xff]   ;;  %v1603_v16 = vld [vmem:[%s1911_s3 + $0x40] sm:$0xff]   ;;  %v643_v25 = vld [vmem:[%s1915_s7 + $0x70] sm:$0xff] }
  0x11   : > { %1404 = vmatpush3.bf16.msra.mxu0 %v1592_v3  ;;  %v1604_v17 = vld [vmem:[%s1911_s3] sm:$0xff]   ;;  %v642_v27 = vld [vmem:[%s1915_s7 + $0x68] sm:$0xff]  ;;  %v640_v29 = vld [vmem:[%s1915_s7 + $0x58] sm:$0xff] }
  0x12   : > { %1405 = vmatprep.subr.bf16.mxu0 %v1593_v4  ;;  %534 = vmatprep.mubr.bf16.mxu0 %v403_v13  ;;  %v542_v19 = vld [vmem:[%s1913_s5] sm:$0x3]  ;;  %v639_v30 = vld [vmem:[%s1915_s7 + $0x50] sm:$0xff]  ;;  %v638_v31 = vld [vmem:[%s1915_s7 + $0x48] sm:$0xff] }
  0x13   : > { %1464 = vmatpush3.msk.msra.mxu1 %vm554_vm0, %v542_v19  ;;  %v641_v28 = vld [vmem:[%s1915_s7 + $0x60] sm:$0xff]  ;;  %v636_v33 = vld [vmem:[%s1915_s7 + $0x38] sm:$0xff]  ;;  %v635_v34 = vld [vmem:[%s1915_s7 + $0x30] sm:$0xff] }
  0x14   : > { %1468 = vmatprep.subr.mxu1 %v1622_v18  ;;  %v637_v32 = vld [vmem:[%s1915_s7 + $0x40] sm:$0xff]  ;;  %v634_v35 = vld [vmem:[%s1915_s7 + $0x28] sm:$0xff]  ;;  %v632_v37 = vld [vmem:[%s1915_s7 + $0x18] sm:$0xff] }
  0x15   : > { %1406 = vmatpush3.bf16.msra.mxu0 %v1594_v5  ;;  %v633_v36 = vld [vmem:[%s1915_s7 + $0x20] sm:$0xff]  ;;  %v631_v38 = vld [vmem:[%s1915_s7 + $0x10] sm:$0xff]  ;;  %v630_v39 = vld [vmem:[%s1915_s7 + $0x8] sm:$0xff] }
  0x16   : > { %1407 = vmatprep.subr.bf16.mxu0 %v1595_v6  ;;  %v629_v40 = vld [vmem:[%s1915_s7] sm:$0xff]  ;;  %v1607_v48 = vld [vmem:[%s1729_s21 + $0x8] sm:$0xff]   ;;  %v1608_v49 = vld [vmem:[%s1729_s21 + $0x10] sm:$0xff]  }
  0x17   : > { %v1605_v41 = vld [vmem:[%s1910_s2] sm:$0xff]   ;;  %v1609_v50 = vld [vmem:[%s1729_s21 + $0x18] sm:$0xff]  }
  0x18   : > { %v1368_v42 = vld [vmem:[%s1914_s6] ss:$0 sm:$0xff]  ;;  %v1389_v19 = vld [vmem:[%s1912_s4 + $0x4] sm:$0xf] }
  0x19   : > { %1408 = vmatpush3.bf16.msra.mxu0 %v1596_v7  ;;  %v1606_v46 = vld [vmem:[%s1729_s21] sm:$0xff]   ;;  %s1624_s21 = smov 121  }
  0x1a   : > { %1409 = vmatprep.subr.bf16.mxu0 %v1597_v8  ;;  %v1371_v51 = vld [vmem:[%s1916_s8] ss:$0 sm:$0xff] }
  0x1b   : > { %v952_v62 = vld [vmem:[%s1912_s4] sm:$0xf] }
  0x1c   : > { %v1059_v5 = vld [vmem:[%s1912_s4] sm:$0xf] }
  0x1d   : > { %1410 = vmatpush3.bf16.msra.mxu0 %v1598_v9  ;;  %v844_v6 = vld [vmem:[%s1912_s4] sm:$0xf] }
  0x1e   : > { %1411 = vmatprep.subr.bf16.mxu0 %v1599_v10  ;;  %v1166_v7 = vld [vmem:[%s1912_s4] sm:$0xf] }
  0x21   : > { %1412 = vmatpush3.bf16.msra.mxu0 %v1600_v12  ;;  %v1382_v12 = vld [vmem:[%s1912_s4 + $0x4] sm:$0xf] }
  0x22   : > { %1413 = vmatprep.subr.bf16.mxu0 %v1601_v14  ;;  %v1385_v14 = vld [vmem:[%s1912_s4 + $0x4] sm:$0xf] }
  0x25   : > { %1414 = vmatpush3.bf16.msra.mxu0 %v1602_v15 }
  0x26   : > { %1415 = vmatprep.subr.bf16.mxu0 %v1603_v16 }
  0x29   : > { %1416 = vmatpush3.bf16.msra.mxu0 %v1604_v17 }
  0x2a   : > { %1513 = vmatprep.subr.bf16.mxu0 %v1622_v18 }
  0x2c   : > { %535 = vmatmul.mubr.bf16.vlgmr.msra.gmra.mxu0 %v1351_v11 }
  0x2d   : > { %1515 = vmatprep.mubr.msk.bf16.mxu0 %vm1623_vm1, %v1622_v18 }
  0xec   : > { %v1417_v20 = vpop.f32.mrf.mxu0 }
  0xee   : > { %v1418_v21 = vpop.f32.mrf.mxu0 }
  0xef   : > { %v1419_v22 = vadd.f32 %v1418_v21, %v1417_v20  ;;  %v1393_v21 = vld [vmem:[%s1912_s4 + $0x4] sm:$0xf] }
  0xf0   : > { %v1420_v24 = vpop.f32.mrf.mxu0 }
  0xf1   : > { %1466 = vmatmul.mubr.msk.f32.vlgmr.msra.gmra.mxu1 %vm550_vm2, %v1419_v22 }
  0xf2   : > { %v1421_v26 = vpop.f32.mrf.mxu0  ;;  %1469 = vmatpush3.msra.mxu1 %v644_v23  ;;  %1500 = vmatprep.mubr.msk.f32.mxu1 %vm1623_vm1, %v1622_v18 }
  0xf3   : > { %1470 = vmatprep.subr.mxu1 %v1622_v18 }
  0xf4   : > { %1471 = vmatpush3.msra.mxu1 %v643_v25 }
  0xf5   : > { %1472 = vmatprep.subr.mxu1 %v1622_v18 }
  0xf6   : > { %1473 = vmatpush3.msra.mxu1 %v642_v27 }
  0xf7   : > { %1474 = vmatprep.subr.mxu1 %v1622_v18 }
  0xf8   : > { %1475 = vmatpush3.msra.mxu1 %v641_v28 }
  0xf9   : > { %1476 = vmatprep.subr.mxu1 %v1622_v18 }
  0xfa   : > { %1477 = vmatpush3.msra.mxu1 %v640_v29 }
  0xfb   : > { %1478 = vmatprep.subr.mxu1 %v1622_v18 }
  0xfc   : > { %1479 = vmatpush3.msra.mxu1 %v639_v30 }
  0xfd   : > { %1480 = vmatprep.subr.mxu1 %v1622_v18 }
  0xfe   : > { %1481 = vmatpush3.msra.mxu1 %v638_v31 }
  0xff   : > { %1482 = vmatprep.subr.mxu1 %v1622_v18 }
 0x100   : > { %1483 = vmatpush3.msra.mxu1 %v637_v32 }
 0x101   : > { %1484 = vmatprep.subr.mxu1 %v1622_v18 }
 0x102   : > { %1485 = vmatpush3.msra.mxu1 %v636_v33 }
 0x103   : > { %1486 = vmatprep.subr.mxu1 %v1622_v18 }
 0x104   : > { %1487 = vmatpush3.msra.mxu1 %v635_v34 }
 0x105   : > { %1488 = vmatprep.subr.mxu1 %v1622_v18 }
 0x106   : > { %1489 = vmatpush3.msra.mxu1 %v634_v35 }
 0x107   : > { %1490 = vmatprep.subr.mxu1 %v1622_v18 }
 0x108   : > { %1491 = vmatpush3.msra.mxu1 %v633_v36 }
 0x109   : > { %1492 = vmatprep.subr.mxu1 %v1622_v18 }
 0x10a   : > { %1493 = vmatpush3.msra.mxu1 %v632_v37 }
 0x10b   : > { %1494 = vmatprep.subr.mxu1 %v1622_v18 }
 0x10c   : > { %1495 = vmatpush3.msra.mxu1 %v631_v38 }
 0x10d   : > { %1496 = vmatprep.subr.mxu1 %v1622_v18 }
 0x10e   : > { %1497 = vmatpush3.msra.mxu1 %v630_v39 }
 0x10f   : > { %1498 = vmatprep.subr.mxu1 %v1622_v18 }
 0x110   : > { %1499 = vmatpush3.msra.mxu1 %v629_v40 }
 0x111   : > { %1503 = vmatprep.subr.bf16.mxu1 %v1605_v41 }
 0x1b1   : > { %v624_v43 = vpop.f32.mrf.mxu1 }
 0x1b2   : > { %v625_v44 = vadd.f32 %v1368_v42, %v624_v43 }
 0x1b3   : > { %v1467_v45 = vpop.f32.mrf.mxu1 }
 0x1b4   : > { %v628_v47 = vmax.f32 %v625_v44, 0.0 }
 0x1b6   : > { %1501 = vmatmul.mubr.f32.vlgmr.msra.gmra.mxu1 %v628_v47 }
 0x1b7   : > { %1504 = vmatpush3.bf16.msra.mxu1 %v1605_v41  ;;  %1505 = vmatprep.mubr.msk.bf16.mxu1 %vm762_vm3, %v1606_v46 }
 0x1b8   : > { %1525 = vmatprep.subr.bf16.mxu1 %v1622_v18 }
 0x1ba   : > { %1506 = vmatmul.mubr.msk.bf16.vlgmr.msra.gmra.mxu1 %vm762_vm3, %v1607_v48 }
 0x1bb   : > { %1509 = vmatprep.mubr.msk.bf16.mxu1 %vm762_vm3, %v1608_v49 }
 0x1c2   : > { %1510 = vmatmul.mubr.msk.bf16.gmra.mxu1 %vm762_vm3, %v1609_v50 }
 0x1c3   : > { %1527 = vmatprep.mubr.msk.bf16.mxu1 %vm1623_vm1, %v1622_v18 }
 0x276   : > { %v718_v52 = vpop.f32.mrf.mxu1 }
 0x277   : > { %v719_v53 = vadd.f32 %v1371_v51, %v718_v52 }
 0x278   : > { %v1502_v54 = vpop.f32.mrf.mxu1 }
 0x279   : > { %v723_v55 = vsel %vm722_vm4, %v719_v53, -inf }
 0x27a   : > { %724 = vmax.xlane.f32.xlu0 %v723_v55  ;;  %v1507_v56 = vpop.f32.mrf.mxu1 }
 0x27c   : > { %v809_v57 = vpop.f32.mrf.mxu1 }
 0x27e   : > { %v1508_v58 = vpop.f32.mrf.mxu1 }
 0x27f   : > { %v841_v59 = vpack.c.bf16 %v1508_v58, %v1507_v56 }
 0x280   : > { %v812_v60 = vpop.f32.mrf.mxu1 }
 0x281   : > { %v840_v61 = vpack.c.bf16 %v812_v60, %v809_v57  ;;  %1004 = vrot.lane.b32.xlu1 %v841_v59, %s1624_s21  ;;  %1526 = vmatpush3.bf16.msra.mxu1 %v841_v59 }
 0x282   : > { %v1511_v63 = vpop.f32.mrf.mxu1  ;;  %1537 = vmatprep.subr.bf16.mxu1 %v1622_v18 }
 0x283   : > { %1514 = vmatpush3.bf16.msra.mxu0 %v840_v61 }
 0x284   : > { %v825_v0 = vpop.f32.mrf.mxu1  ;;  %1528 = vmatmul.mubr.msk.bf16.vlgmr.msra.gmra.mxu1 %vm762_vm3, %v952_v62  ;;  %1519 = vmatprep.subr.bf16.mxu0 %v1622_v18 }
 0x285   : > { %1539 = vmatprep.mubr.msk.bf16.mxu1 %vm1623_vm1, %v1622_v18 }
 0x286   : > { %v1512_v1 = vpop.f32.mrf.mxu1  ;;  %1516 = vmatmul.mubr.msk.bf16.vlgmr.msra.gmra.mxu0 %vm762_vm3, %v844_v6 }
 0x287   : > { %v843_v4 = vpack.c.bf16 %v1512_v1, %v1511_v63  ;;  %1521 = vmatprep.mubr.msk.bf16.mxu0 %vm1623_vm1, %v1622_v18 }
 0x288   : > { %v828_v2 = vpop.f32.mrf.mxu1 }
 0x289   : > { %v842_v3 = vpack.c.bf16 %v828_v2, %v825_v0 }
 0x28b   : > { %1111 = vrot.lane.b32.xlu1 %v842_v3, %s1624_s21  ;;  %1538 = vmatpush3.bf16.msra.mxu1 %v842_v3 }
 0x28c   : > { %1549 = vmatprep.subr.bf16.mxu1 %v1622_v18 }
 0x28e   : > { %1540 = vmatmul.mubr.msk.bf16.vlgmr.msra.gmra.mxu1 %vm762_vm3, %v1059_v5 }
 0x28f   : > { %1218 = vrot.lane.b32.xlu1 %v843_v4, %s1624_s21  ;;  %1550 = vmatpush3.bf16.msra.mxu1 %v843_v4 }
 0x290   : > { %897 = vrot.lane.b32.xlu0 %v840_v61, %s1624_s21  ;;  %1551 = vmatprep.mubr.msk.bf16.mxu1 %vm1623_vm1, %v1622_v18 }
 0x296   : > { %1552 = vmatmul.mubr.msk.bf16.vlgmr.msra.gmra.mxu1 %vm762_vm3, %v1166_v7 }
 0x2f3   : > { %v1005_v13 = vpop.permute.xlu1 %1004 }
 0x2fd   : > { %v1112_v15 = vpop.permute.xlu1 %1111 }
 0x301   : > { %v1219_v20 = vpop.permute.xlu1 %1218 }
 0x303   : > { %v725_v8 = vpop.xlane.xlu0 %724 }
 0x304   : > { %v726_v9 = vsub.f32 %v719_v53, %v725_v8 }
 0x306   : > { %v727_v10 = vmul.f32 1.442695, %v726_v9 }
 0x307   : > { %v898_v11 = vpop.permute.xlu0 %897 }
 0x308   : > { %1610 = vpow2.f32 %v727_v10  ;;  %1520 = vmatpush3.bf16.msra.mxu0 %v898_v11 }
 0x309   : > { %1531 = vmatprep.subr.bf16.mxu0 %v1622_v18 }
 0x30b   : > { %1522 = vmatmul.mubr.msk.bf16.vlgmr.msra.gmra.mxu0 %vm762_vm3, %v1382_v12 }
 0x30c   : > { %1532 = vmatpush3.bf16.msra.mxu0 %v1005_v13  ;;  %1533 = vmatprep.mubr.msk.bf16.mxu0 %vm1623_vm1, %v1622_v18 }
 0x30d   : > { %1543 = vmatprep.subr.bf16.mxu0 %v1622_v18 }
 0x313   : > { %1534 = vmatmul.mubr.msk.bf16.vlgmr.msra.gmra.mxu0 %vm762_vm3, %v1385_v14 }
 0x314   : > { %1544 = vmatpush3.bf16.msra.mxu0 %v1112_v15  ;;  %1545 = vmatprep.mubr.msk.bf16.mxu0 %vm1623_vm1, %v1622_v18 }
 0x315   : > { %v1611_v16 = vpop.eup %1610  ;;  %1555 = vmatprep.subr.bf16.mxu0 %v1622_v18 }
 0x316   : > { %v729_v17 = vsel %vm722_vm4, %v1611_v16, 0.0 }
 0x317   : > { %730 = vadd.xlane.f32.xlu1 %v729_v17 }
 0x31b   : > { %1546 = vmatmul.mubr.msk.bf16.vlgmr.msra.gmra.mxu0 %vm762_vm3, %v1389_v19 }
 0x31c   : > { %1556 = vmatpush3.bf16.msra.mxu0 %v1219_v20  ;;  %1557 = vmatprep.mubr.msk.bf16.mxu0 %vm1623_vm1, %v1622_v18 }
 0x323   : > { %1558 = vmatmul.mubr.msk.bf16.vlgmr.msra.gmra.mxu0 %vm762_vm3, %v1393_v21 }
 0x344   : > { %v1893_v29 = vpop.f32.mrf.mxu1 }
 0x346   : > { %v882_v22 = vpop.f32.mrf.mxu0  ;;  %v1529_v18 = vpop.f32.mrf.mxu1 }
 0x348   : > { %v1517_v23 = vpop.f32.mrf.mxu0  ;;  %v993_v31 = vpop.f32.mrf.mxu1 }
 0x34a   : > { %v885_v24 = vpop.f32.mrf.mxu0  ;;  %v1530_v32 = vpop.f32.mrf.mxu1 }
 0x34c   : > { %v1518_v25 = vpop.f32.mrf.mxu0 }
 0x34e   : > { %v1097_v34 = vpop.f32.mrf.mxu1 }
 0x350   : > { %v1541_v35 = vpop.f32.mrf.mxu1 }
 0x352   : > { %v1100_v37 = vpop.f32.mrf.mxu1 }
 0x354   : > { %v1542_v38 = vpop.f32.mrf.mxu1 }
 0x356   : > { %v1204_v48 = vpop.f32.mrf.mxu1 }
 0x358   : > { %v1553_v50 = vpop.f32.mrf.mxu1 }
 0x35a   : > { %v1207_v52 = vpop.f32.mrf.mxu1 }
 0x35c   : > { %v1554_v54 = vpop.f32.mrf.mxu1 }
 0x3a0   : > { %v731_v26 = vpop.xlane.xlu1 %730 }
 0x3a1   : > { %1612 = vrcp.f32 %v731_v26 }
 0x3ae   : > { %v1613_v27 = vpop.eup %1612 }
 0x3af   : > { %v733_v28 = vmul.f32 %v1613_v27, %v1611_v16 }
 0x3b1   : > { %943 = vrot.lane.b32.xlu0 %v733_v28, %s1625_s19  ;;  %1561 = vpush %v733_v28  ;;  %v996_v30 = vrot.slane %v733_v28, 1  ;;  %v1103_v33 = vrot.slane %v733_v28, 2  ;;  %v1210_v36 = vrot.slane %v733_v28, 3 }
 0x3b5   : > { %1050 = vrot.lane.b32.xlu0 %v996_v30, %s1625_s19 }
 0x3b9   : > { %1157 = vrot.lane.b32.xlu0 %v1103_v33, %s1625_s19 }
 0x3bd   : > { %1264 = vrot.lane.b32.xlu0 %v1210_v36, %s1625_s19 }
 0x3cb   : > { %v937_v39 = vpop.f32.mrf.mxu0 }
 0x3cd   : > { %v1523_v40 = vpop.f32.mrf.mxu0 }
 0x3cf   : > { %v940_v41 = vpop.f32.mrf.mxu0 }
 0x3d1   : > { %v1524_v42 = vpop.f32.mrf.mxu0 }
 0x3d3   : > { %v1044_v43 = vpop.f32.mrf.mxu0 }
 0x3d5   : > { %v1535_v44 = vpop.f32.mrf.mxu0 }
 0x3d7   : > { %v1047_v45 = vpop.f32.mrf.mxu0 }
 0x3d9   : > { %v1536_v46 = vpop.f32.mrf.mxu0 }
 0x3db   : > { %v1151_v47 = vpop.f32.mrf.mxu0 }
 0x3dd   : > { %v1547_v49 = vpop.f32.mrf.mxu0 }
 0x3df   : > { %v1154_v51 = vpop.f32.mrf.mxu0 }
 0x3e1   : > { %v1548_v53 = vpop.f32.mrf.mxu0 }
 0x3e2   : > { %s1562_s21 = spop %1561 }
 0x3e3   : > { %v1258_v55 = vpop.f32.mrf.mxu0  ;;  %v890_v63 = vstv %s1562_s21 }
 0x3e4   : > { %v892_v1 = vmul.f32 %v890_v63, %v882_v22 }
 0x3e5   : > { %v1559_v56 = vpop.f32.mrf.mxu0 }
 0x3e7   : > { %v1261_v57 = vpop.f32.mrf.mxu0 }
 0x3e9   : > { %v1560_v58 = vpop.f32.mrf.mxu0 }
 0x423   : > { %v944_v59 = vpop.permute.xlu0 %943 }
 0x424   : > { %1563 = vpush %v944_v59 }
 0x425   : > { %1565 = vpush %v996_v30 }
 0x427   : > { %v1051_v60 = vpop.permute.xlu0 %1050 }
 0x428   : > { %1567 = vpush %v1051_v60 }
 0x429   : > { %1569 = vpush %v1103_v33 }
 0x42b   : > { %v1158_v61 = vpop.permute.xlu0 %1157 }
 0x42c   : > { %1571 = vpush %v1158_v61 }
 0x42d   : > { %1573 = vpush %v1210_v36 }
 0x42f   : > { %v1265_v62 = vpop.permute.xlu0 %1264 }
 0x430   : > { %1575 = vpush %v1265_v62 }
 0x455   : > { %s1564_s20 = spop %1563 }
 0x456   : > { %v946_v0 = vstv %s1564_s20  ;;  %s1566_s22 = spop %1565 }
 0x457   : > { %v948_v2 = vmul.f32 %v946_v0, %v937_v39  ;;  %v998_v3 = vstv %s1566_s22 }
 0x458   : > { %v1000_v6 = vmul.f32 %v998_v3, %v1893_v29 }
 0x459   : > { %v949_v4 = vadd.f32 %v948_v2, %v892_v1  ;;  %s1568_s26 = spop %1567 }
 0x45a   : > { %v1053_v5 = vstv %s1568_s26  ;;  %s1570_s27 = spop %1569 }
 0x45b   : > { %951 = vst.msk [vmem:[%s352_s25] sm:$0x7f] %vm950_vm5, %v949_v4  ;;  %v1055_v7 = vmul.f32 %v1053_v5, %v1044_v43  ;;  %v1105_v8 = vstv %s1570_s27 }
 0x45c   : > { %v1107_v11 = vmul.f32 %v1105_v8, %v1097_v34 }
 0x45d   : > { %v1056_v9 = vadd.f32 %v1055_v7, %v1000_v6  ;;  %s1572_s28 = spop %1571 }
 0x45e   : > { %v1160_v10 = vstv %s1572_s28  ;;  %s1574_s10 = spop %1573 }
 0x45f   : > { %1387 = vst.msk [vmem:[%s352_s25 + $0x8] sm:$0x7f] %vm950_vm5, %v1056_v9  ;;  %v1162_v12 = vmul.f32 %v1160_v10, %v1151_v47  ;;  %v1212_v13 = vstv %s1574_s10 }
 0x460   : > { %v1214_v16 = vmul.f32 %v1212_v13, %v1204_v48 }
 0x461   : > { %v1163_v14 = vadd.f32 %v1162_v12, %v1107_v11  ;;  %s1576_s11 = spop %1575 }
 0x462   : > { %v1267_v15 = vstv %s1576_s11 }
 0x463   : > { %1391 = vst.msk [vmem:[%s352_s25 + $0x10] sm:$0x7f] %vm950_vm5, %v1163_v14  ;;  %v1269_v17 = vmul.f32 %v1267_v15, %v1258_v55 }
 0x465   : > { %v1270_v19 = vadd.f32 %v1269_v17, %v1214_v16 }
 0x467   : > { %1395 = vst.msk [vmem:[%s352_s25 + $0x18] sm:$0x7f] %vm950_vm5, %v1270_v19 }
 0x468 PF: > { %s19_s30 = sadd.s32 1, %s1620_s30  }
 0x469   : > { %p16_p4 = scmp.ge.s32.totalorder %s19_s30, 4  }
 0x46b   :  { %18 = sbr.rel (!%p16_p4) target bundleno = 1 (0x1), region = 93 }

</bundles_post_ra>
